<compile_context>
chip_gen: v7x
topology: tpu7x:2x2x1
jax: 0.10.0
libtpu: 0.0.40
codegen_flags: <defaults>
</compile_context>

<pallas_src>
import jax
import jax.numpy as jnp
from jax.experimental import pallas as pl
from jax.experimental.pallas import tpu as pltpu


def _identity_kernel(x_ref, o_ref):
    # Pure pass-through: load the tile and store it unchanged.
    o_ref[...] = x_ref[...]


# Per-buffer block budget.  2 MiB blocks -> (in + out) x 2 pipeline buffers
# ~= 8 MiB of VMEM: comfortably inside the scoped limit on every generation
# (v5e 16 MiB default, v6e/v7x 32 MiB default, v7x 64 MiB physical).
_TARGET_BLOCK_BYTES = 2 * 1024 * 1024
_LANE = 128
_MAX_LANE_COLS = 2048


def _min_sublane(dtype) -> int:
    """Dtype-aware minimum sublane tile (packed sublanes for narrow dtypes)."""
    itemsize = jnp.dtype(dtype).itemsize
    if itemsize >= 4:
        return 8     # f32 / i32
    if itemsize == 2:
        return 16    # bf16 / f16 / i16
    return 32        # int8 / fp8


def _lane_dense_factorization(total: int):
    """Factor `total` elements into (rows, cols) with cols a lane-dense
    multiple of 128 (preferring wider), or None if not divisible by 128."""
    for c in (_MAX_LANE_COLS, 1024, 512, 256, _LANE):
        if total % c == 0:
            return total // c, c
    return None


def _row_block(rows: int, cols: int, dtype) -> int:
    """Pick a row-block size: multiple of the dtype's min sublane tile,
    sized so one block is ~_TARGET_BLOCK_BYTES, capped by the array."""
    sub = _min_sublane(dtype)
    itemsize = jnp.dtype(dtype).itemsize
    if rows <= sub:
        return rows  # full extent is always a legal block dim
    br = _TARGET_BLOCK_BYTES // (cols * itemsize)
    br = max(sub, (br // sub) * sub)
    return min(br, (rows // sub) * sub)


def input_module_forward(x: jax.Array, *, donate: bool = False) -> jax.Array:
    """Identity forward pass (Pallas TPU copy kernel).

    donate=True adds input_output_aliases={0: 0} so the output aliases the
    input buffer (the real win when the caller donates x, e.g. under
    jit(..., donate_argnums=0)); with a live, non-donated input XLA inserts a
    defensive copy, so the default is False.
    """
    orig_shape = x.shape
    dtype = x.dtype

    if x.size == 0:
        return x  # nothing to copy

    total = x.size
    fac = _lane_dense_factorization(total)

    if fac is not None:
        # Preferred path: lane-dense flatten (cols = multiple of 128).
        R, C = fac
        x2 = x.reshape(R, C)
        br = _row_block(R, C, dtype)
        grid = (pl.cdiv(R, br),)
        in_specs = [pl.BlockSpec((br, C), lambda i: (i, 0))]
        out_spec = pl.BlockSpec((br, C), lambda i: (i, 0))
        semantics = ("parallel",)
    else:
        # Fallback (total not divisible by 128): flatten on the natural last
        # dim and tile both axes with capped blocks + cdiv (ragged edges are
        # handled by Pallas; no full-extent blow-ups).
        if x.ndim == 0:
            x2 = x.reshape(1, 1)
        elif x.ndim == 1:
            x2 = x.reshape(1, -1)
        else:
            x2 = x.reshape(-1, orig_shape[-1])
        R, C = x2.shape
        if C < _LANE:
            bc = C                                   # full-dim lane block
        else:
            bc = min((C // _LANE) * _LANE, 1024)     # lane-dense, capped
        br = _row_block(R, bc, dtype)
        grid = (pl.cdiv(R, br), pl.cdiv(C, bc))
        in_specs = [pl.BlockSpec((br, bc), lambda i, j: (i, j))]
        out_spec = pl.BlockSpec((br, bc), lambda i, j: (i, j))
        semantics = ("parallel", "parallel")

    out2 = pl.pallas_call(
        _identity_kernel,
        out_shape=jax.ShapeDtypeStruct(x2.shape, dtype),
        grid=grid,
        in_specs=in_specs,
        out_specs=out_spec,
        input_output_aliases=({0: 0} if donate else {}),
        compiler_params=pltpu.CompilerParams(
            dimension_semantics=semantics,
            vmem_limit_bytes=32 * 1024 * 1024,  # explicit headroom; safe on all gens
        ),
    )(x2)

    return out2.reshape(orig_shape)


if __name__ == "__main__":
    key = jax.random.PRNGKey(0)
    # Small NCHW input consistent with the module's intended downstream use:
    # batch=2, channels=4, spatial=16x16.
    x = jax.random.normal(key, (2, 4, 16, 16), dtype=jnp.float32)

    # Default (non-aliased) path.
    y = input_module_forward(x)
    jax.block_until_ready(y)
    assert y.shape == x.shape and y.dtype == x.dtype
    assert bool(jnp.all(y == x))

    # Aliased (donation-friendly) path — identical semantics.
    y2 = input_module_forward(x, donate=True)
    jax.block_until_ready(y2)
    assert bool(jnp.all(y2 == x))

    print("KERNEL_OK")
</pallas_src>

<mosaic_0001>
module attributes {stable_mosaic.version = 11 : i64} {
  func.func @_identity_kernel(%arg0: i32, %arg1: memref<1x2048xf32, #tpu.memory_space<vmem>>, %arg2: memref<1x2048xf32, #tpu.memory_space<vmem>>) attributes {dimension_semantics = [#tpu.dimension_semantics<parallel>], iteration_bounds = array<i64: 1>, scalar_prefetch = 0 : i64, scratch_operands = 0 : i64, tpu.core_type = #tpu.core_type<tc>, window_params = [{transform_indices = @transform_0, window_bounds = array<i64: 1, 2048>}, {transform_indices = @transform_1, window_bounds = array<i64: 1, 2048>}]} {
    %c0 = arith.constant 0 : index
    %c0_0 = arith.constant 0 : index
    %0 = vector.load %arg1[%c0, %c0_0] : memref<1x2048xf32, #tpu.memory_space<vmem>>, vector<1x2048xf32>
    %c0_1 = arith.constant 0 : index
    %c0_2 = arith.constant 0 : index
    %1 = vector.load %arg2[%c0_1, %c0_2] : memref<1x2048xf32, #tpu.memory_space<vmem>>, vector<1x2048xf32>
    tpu.vector_store %arg2[%c0_1, %c0_2], %0 {strides = array<i32>} : memref<1x2048xf32, #tpu.memory_space<vmem>>, vector<1x2048xf32>,
    return
  }
  func.func @transform_0(%arg0: i32) -> (i32, i32) {
    %c0_i32 = arith.constant 0 : i32
    %c0_i32_0 = arith.constant 0 : i32
    return %arg0, %c0_i32 : i32, i32
  }
  func.func @transform_1(%arg0: i32) -> (i32, i32) {
    %c0_i32 = arith.constant 0 : i32
    %c0_i32_0 = arith.constant 0 : i32
    return %arg0, %c0_i32 : i32, i32
  }
}

</mosaic_0001>

<bundles_post_ra>
// kernel: tpu_custom_call.1
= control target key start
LH: loop header
LB: loop body
LE: loop exit
PB: predicated region body
PF: predicated region fallthrough
CT: control target
= control target key end

     0   :  { %6 = vsyncpa [#allocation3], 0  ;;  %s126_s0 = inlined_call_operand.hbm [shape: f32[1,2048], index: 0, kind: input, shape index: {}]   ;;  %s127_s1 = inlined_call_operand.hbm [shape: f32[1,2048], index: 1, kind: output, shape index: {}]  }
   0x1   :  { %7 = vsyncpa [#allocation4], 0  ;;  %s90_s6 = smov [#allocation2]   ;;  %s42_s10 = scalar_lea.hbm %s126_s0, 256 }
   0x2   :  { %s14_s7 = sshll.u32 %s90_s6, 4  ;;  %p43_p0 = scmp.ne.s32.totalorder %s126_s0, %s42_s10  ;;  %s15_s7 = int_to_ptr.vmem [resolvable:$true] %s14_s7 }
   0x3   :  { %p46_p1 = scmp.lt.u32.totalorder %s42_s10, %s126_s0 }
   0x5   :  { %p48_p2 = pnand %p46_p1, %p43_p0 }
   0x7   :  { %51 = shalt.err (!%p48_p2)
}
   0x8   :  { %s52_s15 = scalar_lea.vmem %s15_s7, 256  ;;  %p57_p4 = scmp.lt.s32.totalorder %s15_s7, %s15_s7 }
   0x9   :  { %p53_p3 = scmp.ne.s32.totalorder %s15_s7, %s52_s15  ;;  %p58_p5 = scmp.lt.s32.totalorder %s52_s15, %s52_s15 }
   0xb   :  { %p59_p6 = por %p58_p5, %p57_p4 }
   0xd   :  { %p60_p7 = pnand %p59_p6, %p53_p3 }
   0xf   :  { %63 = shalt.err (!%p60_p7)
}
  0x10   :  { %17 = dma.hbm_to_vmem [thread:$0]  %s126_s0, 256, %s15_s7, [#allocation3]  }
  0x11   :  { %86 = dma.done.wait [#allocation3], 256  }
  0x12   :  { %87 = vsyncadd [#allocation3], 4294967040  ;;  %s91_s18 = smov [#allocation5]   ;;  %v21_v0 = vld [vmem:[#allocation2] sm:$0xff]  ;;  %v22_v1 = vld [vmem:[#allocation2 + $0x8] sm:$0xff] }
  0x13   :  { %s31_s19 = sshll.u32 %s91_s18, 4  ;;  %23 = vst [vmem:[#allocation5] sm:$0xff] %v21_v0  ;;  %24 = vst [vmem:[#allocation5 + $0x8] sm:$0xff] %v22_v1  ;;  %s32_s19 = int_to_ptr.vmem [resolvable:$true] %s31_s19 }
  0x14   :  { %s64_s20 = scalar_lea.vmem %s32_s19, 256  ;;  %p69_p9 = scmp.lt.s32.totalorder %s32_s19, %s32_s19 }
  0x15   :  { %p65_p8 = scmp.ne.s32.totalorder %s32_s19, %s64_s20  ;;  %p70_p10 = scmp.lt.s32.totalorder %s64_s20, %s64_s20 }
  0x17   :  { %p71_p11 = por %p70_p10, %p69_p9 }
  0x19   :  { %p72_p12 = pnand %p71_p11, %p65_p8 }
  0x1b   :  { %75 = shalt.err (!%p72_p12)
}
  0x1c   :  { %s76_s0 = scalar_lea.hbm %s127_s1, 256 }
  0x1d   :  { %p77_p13 = scmp.ne.s32.totalorder %s127_s1, %s76_s0  ;;  %p80_p0 = scmp.lt.u32.totalorder %s76_s0, %s127_s1 }
  0x1f   :  { %p82_p1 = pnand %p80_p0, %p77_p13 }
  0x21   :  { %85 = shalt.err (!%p82_p1)
}
  0x22   :  { %34 = dma.vmem_to_hbm [thread:$0]  %s32_s19, 256, %s127_s1, [#allocation4]  }
  0x23   :  { %88 = dma.done.wait [#allocation4], 256  }
  0x24   :  { %89 = vsyncadd [#allocation4], 4294967040 }
  0x25   :  { %38 = vsyncpa [#allocation3], 1 }
  0x26   :  { %39 = vsyncpa [#allocation4], 1 }

</bundles_post_ra>
